<compile_context>
chip_gen: v7x
topology: tpu7x:2x2x1
jax: 0.10.0
libtpu: 0.0.40
codegen_flags: <defaults>
</compile_context>

<pallas_src>
import jax
import jax.numpy as jnp
from jax.experimental import pallas as pl
from jax.experimental.pallas import tpu as pltpu


def _round_up(x, m):
    return ((x + m - 1) // m) * m


# ----------------------------- Pallas kernel -------------------------------
def _make_attention_kernel(F_int, F_l, F_g, use_mxu):
    def kernel(g_ref, x_ref, wg_ref, wx_ref, b_ref, wpsi_ref, bpsi_ref, out_ref):
        # Blocks are (1, C, T): channels on sublanes, spatial tile T on lanes.
        g = g_ref[0].astype(jnp.float32)         # (F_l, T)  math in f32
        x = x_ref[0]
        xf = x.astype(jnp.float32)               # (F_g, T)

        if use_mxu:
            # Fused branch projections: one accumulating expression so only a
            # single (F_int, T) intermediate stays live (v7x MRB can accumulate
            # in place; v5e/v6e avoid an extra pop + add).
            a = jnp.dot(wg_ref[...], g, preferred_element_type=jnp.float32)
            a = a + jnp.dot(wx_ref[...], xf, preferred_element_type=jnp.float32)
        else:
            # Tiny channel counts: the MXU would be <2% utilized, so do the
            # projections as broadcast multiply-adds on the VPU (static unroll).
            a = jnp.zeros((F_int,) + g.shape[-1:], jnp.float32)
            for c in range(F_l):
                a = a + wg_ref[:, c:c + 1] * g[c:c + 1, :]
            for c in range(F_g):
                a = a + wx_ref[:, c:c + 1] * xf[c:c + 1, :]

        # pre-summed branch biases (folded BN) + relu
        a = jnp.maximum(a + b_ref[...], 0.0)

        # psi: F_int -> 1 projection + folded BN + sigmoid.  Lane-wise multiply
        # + sublane reduce (VPU/XLU); bias read as an SMEM scalar; f32 math.
        p = jnp.sum(wpsi_ref[...] * a, axis=0, keepdims=True) + bpsi_ref[0]   # (1, T)
        psi = jax.nn.sigmoid(p)

        # gate x (sublane broadcast of the (1, T) gate row), lane-dense store.
        out_ref[0] = (xf * psi).astype(out_ref.dtype)

    return kernel


def attention_block_pallas(g_r, x_r, wgT, wxT, b_sum, wpsi, bpsi, *, tile_s,
                           vmem_limit_bytes, use_mxu):
    """g_r: (N, F_l, HW), x_r: (N, F_g, HW) -> (N, F_g, HW).  HW % tile_s == 0."""
    N, F_l, HW = g_r.shape
    _, F_gc, _ = x_r.shape
    F_int = wgT.shape[0]
    assert HW % tile_s == 0 and tile_s % 128 == 0

    grid = (N, HW // tile_s)
    kernel = _make_attention_kernel(F_int, F_l, F_gc, use_mxu)
    return pl.pallas_call(
        kernel,
        out_shape=jax.ShapeDtypeStruct((N, F_gc, HW), x_r.dtype),
        grid_spec=pltpu.PrefetchScalarGridSpec(
            num_scalar_prefetch=0,
            grid=grid,
            in_specs=[
                pl.BlockSpec((1, F_l, tile_s), lambda n, s: (n, 0, s)),    # g
                pl.BlockSpec((1, F_gc, tile_s), lambda n, s: (n, 0, s)),   # x
                pl.BlockSpec((F_int, F_l), lambda n, s: (0, 0)),           # Wg^T
                pl.BlockSpec((F_int, F_gc), lambda n, s: (0, 0)),          # Wx^T
                pl.BlockSpec((F_int, 1), lambda n, s: (0, 0)),             # bg+bx
                pl.BlockSpec((F_int, 1), lambda n, s: (0, 0)),             # wpsi
                pl.BlockSpec(memory_space=pltpu.MemorySpace.SMEM),         # bpsi scalar
            ],
            out_specs=pl.BlockSpec((1, F_gc, tile_s), lambda n, s: (n, 0, s)),
        ),
        compiler_params=pltpu.CompilerParams(
            dimension_semantics=("parallel", "parallel"),
            vmem_limit_bytes=vmem_limit_bytes,
        ),
    )(g_r, x_r, wgT, wxT, b_sum, wpsi, bpsi)


# ------------------------------ JAX glue ------------------------------------
def fold_bn_into_conv(w, b, gamma, beta, mean, var, eps=1e-5):
    """Fold inference-mode BatchNorm into a 1x1 conv.

    w: (C_in, C_out) channels-last matmul weight, b: (C_out,).
    Returns (w_eff, b_eff) such that BN(conv(x)) == x @ w_eff + b_eff.
    """
    scale = gamma / jnp.sqrt(var + eps)           # (C_out,)
    w_eff = w * scale[None, :]
    b_eff = (b - mean) * scale + beta
    return w_eff, b_eff


def _folded_params(params):
    wg_eff, bg_eff = fold_bn_into_conv(params["wg"], params["bg"],
                                       params["bn_g_gamma"], params["bn_g_beta"],
                                       params["bn_g_mean"], params["bn_g_var"])
    wx_eff, bx_eff = fold_bn_into_conv(params["wx"], params["bx"],
                                       params["bn_x_gamma"], params["bn_x_beta"],
                                       params["bn_x_mean"], params["bn_x_var"])
    wpsi_eff, bpsi_eff = fold_bn_into_conv(params["wpsi"], params["bpsi"],
                                           params["bn_p_gamma"], params["bn_p_beta"],
                                           params["bn_p_mean"], params["bn_p_var"])
    return wg_eff, bg_eff, wx_eff, bx_eff, wpsi_eff, bpsi_eff


def _choose_tile(hw128, N, itemsize, F_l, F_g, F_int, vmem_budget, max_tile_lanes):
    """Largest spatial tile (multiple of 128, dividing hw128) fitting the budget."""
    m = hw128 // 128
    # per-lane VMEM footprint: double-buffered streamed blocks + f32 intermediates
    per_lane = 2 * itemsize * (F_l + 2 * F_g) + 4 * (2 * F_int + F_l + F_g + 4)
    tile_cap = max(128, (vmem_budget // per_lane) // 128 * 128)
    tile_cap = min(tile_cap, max_tile_lanes, hw128)
    n_tiles = m
    for k in range(1, m + 1):
        if m % k == 0 and (m // k) * 128 <= tile_cap:
            n_tiles = k
            break
    # keep >= 2 grid steps when possible so v7x's two TensorCores both get work
    if N == 1 and n_tiles == 1 and m >= 2:
        for k in range(2, m + 1):
            if m % k == 0:
                n_tiles = k
                break
    return hw128 // n_tiles


def attention_block_forward(g_nchw, x_nchw, params, *, io_dtype=None,
                            vmem_budget_bytes=40 * 1024 * 1024,
                            max_tile_lanes=32768):
    """NCHW in / NCHW out, matching the PyTorch module's forward (eval-mode BN)."""
    N, C_g, H, W = g_nchw.shape          # g has F_l channels (goes through W_g)
    _, C_x, _, _ = x_nchw.shape          # x has F_g channels (goes through W_x)
    HW = H * W
    F_int = params["wg"].shape[1]

    # NCHW is natively (N, C, H*W): reshape only, no transpose (pure view).
    g_r = g_nchw.reshape(N, C_g, HW)
    x_r = x_nchw.reshape(N, C_x, HW)

    # Optional bf16 HBM traffic (kernel math stays f32, output in io_dtype).
    if io_dtype is not None and g_r.dtype != io_dtype:
        g_r = g_r.astype(io_dtype)
        x_r = x_r.astype(io_dtype)

    wg_eff, bg_eff, wx_eff, bx_eff, wpsi_eff, bpsi_eff = _folded_params(params)

    # Weights pre-transposed to (C_out, C_in) for the (C, spatial) layout; the
    # two branch biases fused into one vector; psi bias is a plain SMEM scalar.
    wgT = wg_eff.T                         # (F_int, F_l)
    wxT = wx_eff.T                         # (F_int, F_g)
    b_sum = (bg_eff + bx_eff)[:, None]     # (F_int, 1)
    wpsi_c = wpsi_eff                      # (F_int, 1)
    bpsi_c = bpsi_eff                      # (1,)  -> SMEM

    itemsize = jnp.dtype(g_r.dtype).itemsize
    hw128 = _round_up(HW, 128)
    tile = _choose_tile(hw128, N, itemsize, C_g, C_x, F_int,
                        vmem_budget_bytes, max_tile_lanes)

    if hw128 != HW:
        # Pad only to the next multiple of 128 (tiles always divide hw128, so
        # there is no extra pad-to-tile copy).  Padded lanes yield x*psi = 0 and
        # are sliced away below.
        pad = hw128 - HW
        g_r = jnp.pad(g_r, ((0, 0), (0, 0), (0, pad)))
        x_r = jnp.pad(x_r, ((0, 0), (0, 0), (0, pad)))

    # VMEM cap sized from the footprint; stay well under v7x's 64 MiB/TC while
    # exceeding the 16/32 MiB scoped defaults on v5e/v6e when useful.
    per_lane = 2 * itemsize * (C_g + 2 * C_x) + 4 * (2 * F_int + C_g + C_x + 4)
    weights_bytes = 4 * (F_int * (C_g + C_x + 2) + 2)
    footprint = per_lane * tile + weights_bytes
    vmem_limit = int(min(max(footprint + (8 << 20), 32 << 20), 56 << 20))

    use_mxu = not (C_g <= 8 and C_x <= 8 and F_int <= 16)

    out_r = attention_block_pallas(g_r, x_r, wgT, wxT, b_sum, wpsi_c, bpsi_c,
                                   tile_s=tile, vmem_limit_bytes=vmem_limit,
                                   use_mxu=use_mxu)

    if hw128 != HW:
        out_r = out_r[:, :, :HW]
    return out_r.reshape(N, C_x, H, W)


def reference_forward(g_nchw, x_nchw, params):
    """Pure-JAX reference mirroring the Pallas path (correctness check)."""
    wg_eff, bg_eff, wx_eff, bx_eff, wpsi_eff, bpsi_eff = _folded_params(params)
    g1 = jnp.einsum("nchw,cf->nfhw", g_nchw, wg_eff) + bg_eff[None, :, None, None]
    x1 = jnp.einsum("nchw,cf->nfhw", x_nchw, wx_eff) + bx_eff[None, :, None, None]
    a = jnp.maximum(g1 + x1, 0.0)
    p = jnp.einsum("nchw,cf->nfhw", a, wpsi_eff) + bpsi_eff[None, :, None, None]
    psi = jax.nn.sigmoid(p)
    return x_nchw * psi


def init_params(key, F_g, F_l, F_int):
    """Deterministic synthetic parameters.

    Conv weights stored channels-last as (C_in, C_out) matmul matrices
    (equivalent to PyTorch Conv2d 1x1 weight of shape (C_out, C_in, 1, 1)).
    BN params are randomized (inference/running-stats mode) to be nontrivial.
    """
    ks = jax.random.split(key, 12)
    return {
        # W_g branch: Conv2d(F_l, F_int)
        "wg": jax.random.normal(ks[0], (F_l, F_int), jnp.float32) * 0.1,
        "bg": jax.random.normal(ks[1], (F_int,), jnp.float32) * 0.1,
        "bn_g_gamma": 1.0 + 0.1 * jax.random.normal(ks[2], (F_int,), jnp.float32),
        "bn_g_beta": 0.1 * jax.random.normal(ks[3], (F_int,), jnp.float32),
        "bn_g_mean": 0.05 * jax.random.normal(ks[4], (F_int,), jnp.float32),
        "bn_g_var": jnp.abs(1.0 + 0.1 * jax.random.normal(ks[5], (F_int,), jnp.float32)),
        # W_x branch: Conv2d(F_g, F_int)
        "wx": jax.random.normal(ks[6], (F_g, F_int), jnp.float32) * 0.1,
        "bx": jax.random.normal(ks[7], (F_int,), jnp.float32) * 0.1,
        "bn_x_gamma": jnp.ones((F_int,), jnp.float32),
        "bn_x_beta": jnp.zeros((F_int,), jnp.float32),
        "bn_x_mean": jnp.zeros((F_int,), jnp.float32),
        "bn_x_var": jnp.ones((F_int,), jnp.float32),
        # psi branch: Conv2d(F_int, 1)
        "wpsi": jax.random.normal(ks[8], (F_int, 1), jnp.float32) * 0.1,
        "bpsi": jax.random.normal(ks[9], (1,), jnp.float32) * 0.1,
        "bn_p_gamma": 1.0 + 0.1 * jax.random.normal(ks[10], (1,), jnp.float32),
        "bn_p_beta": 0.1 * jax.random.normal(ks[11], (1,), jnp.float32),
        "bn_p_mean": jnp.zeros((1,), jnp.float32),
        "bn_p_var": jnp.ones((1,), jnp.float32),
    }


if __name__ == "__main__":
    # Module: Attention_block(F_g, F_l, F_int).  forward(g, x):
    #   g has F_l channels (goes through W_g), x has F_g channels (W_x).
    F_g, F_l, F_int = 4, 4, 8
    N, H, W = 2, 16, 16

    key = jax.random.PRNGKey(0)
    kg, kx, kp = jax.random.split(key, 3)
    g = jax.random.normal(kg, (N, F_l, H, W), jnp.float32)   # NCHW
    x = jax.random.normal(kx, (N, F_g, H, W), jnp.float32)   # NCHW
    params = init_params(kp, F_g, F_l, F_int)

    out = jax.block_until_ready(attention_block_forward(g, x, params))
    ref = reference_forward(g, x, params)
    assert out.shape == (N, F_g, H, W)
    assert jnp.allclose(out, ref, atol=1e-3, rtol=1e-3), "mismatch vs reference"

    # Ragged spatial size (H*W not a multiple of 128) exercises the pad-to-128 path.
    H2, W2 = 10, 10
    g2 = jax.random.normal(kg, (N, F_l, H2, W2), jnp.float32)
    x2 = jax.random.normal(kx, (N, F_g, H2, W2), jnp.float32)
    out2 = jax.block_until_ready(attention_block_forward(g2, x2, params))
    ref2 = reference_forward(g2, x2, params)
    assert out2.shape == (N, F_g, H2, W2)
    assert jnp.allclose(out2, ref2, atol=1e-3, rtol=1e-3), "mismatch (ragged) vs reference"

    # bf16 HBM I/O path (halves memory traffic; in-kernel math stays f32).
    out_bf = jax.block_until_ready(
        attention_block_forward(g, x, params, io_dtype=jnp.bfloat16))
    assert out_bf.dtype == jnp.bfloat16
    assert jnp.allclose(out_bf.astype(jnp.float32), ref, atol=5e-2, rtol=5e-2), \
        "mismatch (bf16 io) vs reference"

    # Larger channel counts exercise the fused MXU path and the N=1 >=2-tile split.
    F_g3, F_l3, F_int3 = 32, 32, 64
    N3, H3, W3 = 1, 32, 32
    params3 = init_params(jax.random.PRNGKey(1), F_g3, F_l3, F_int3)
    g3 = jax.random.normal(kg, (N3, F_l3, H3, W3), jnp.float32)
    x3 = jax.random.normal(kx, (N3, F_g3, H3, W3), jnp.float32)
    out3 = jax.block_until_ready(attention_block_forward(g3, x3, params3))
    ref3 = reference_forward(g3, x3, params3)
    assert out3.shape == (N3, F_g3, H3, W3)
    assert jnp.allclose(out3, ref3, atol=1e-3, rtol=1e-3), "mismatch (MXU path) vs reference"

    print("KERNEL_OK")
</pallas_src>

<mosaic_0001>
module attributes {stable_mosaic.version = 11 : i64} {
  func.func @kernel(%arg0: i32, %arg1: i32, %arg2: memref<1x4x256xf32, #tpu.memory_space<vmem>>, %arg3: memref<1x4x256xf32, #tpu.memory_space<vmem>>, %arg4: memref<8x4xf32, #tpu.memory_space<vmem>>, %arg5: memref<8x4xf32, #tpu.memory_space<vmem>>, %arg6: memref<8x1xf32, #tpu.memory_space<vmem>>, %arg7: memref<8x1xf32, #tpu.memory_space<vmem>>, %arg8: memref<1xf32, #tpu.memory_space<smem>>, %arg9: memref<1x4x256xf32, #tpu.memory_space<vmem>>) attributes {dimension_semantics = [#tpu.dimension_semantics<parallel>, #tpu.dimension_semantics<parallel>], iteration_bounds = array<i64: 2, 1>, scalar_prefetch = 0 : i64, scratch_operands = 0 : i64, tpu.core_type = #tpu.core_type<tc>, window_params = [{transform_indices = @transform_0, window_bounds = array<i64: 1, 4, 256>}, {transform_indices = @transform_1, window_bounds = array<i64: 1, 4, 256>}, {pipeline_mode = #tpu.pipeline_mode<synchronous>, transform_indices = @transform_2, window_bounds = array<i64: 8, 4>}, {pipeline_mode = #tpu.pipeline_mode<synchronous>, transform_indices = @transform_3, window_bounds = array<i64: 8, 4>}, {pipeline_mode = #tpu.pipeline_mode<synchronous>, transform_indices = @transform_4, window_bounds = array<i64: 8, 1>}, {pipeline_mode = #tpu.pipeline_mode<synchronous>, transform_indices = @transform_5, window_bounds = array<i64: 8, 1>}, {transform_indices = @transform_6, window_bounds = array<i64: 1>}, {transform_indices = @transform_7, window_bounds = array<i64: 1, 4, 256>}]} {
    %c0 = arith.constant 0 : index
    %c0_0 = arith.constant 0 : index
    %c0_1 = arith.constant 0 : index
    %0 = vector.load %arg2[%c0, %c0_0, %c0_1] : memref<1x4x256xf32, #tpu.memory_space<vmem>>, vector<1x4x256xf32>
    %1 = vector.shape_cast %0 : vector<1x4x256xf32> to vector<4x256xf32>
    %c0_2 = arith.constant 0 : index
    %c0_3 = arith.constant 0 : index
    %c0_4 = arith.constant 0 : index
    %2 = vector.load %arg3[%c0_2, %c0_3, %c0_4] : memref<1x4x256xf32, #tpu.memory_space<vmem>>, vector<1x4x256xf32>
    %3 = vector.shape_cast %2 : vector<1x4x256xf32> to vector<4x256xf32>
    %cst = arith.constant 0.000000e+00 : f32
    %4 = vector.broadcast %cst : f32 to vector<8x256xf32>
    %c0_5 = arith.constant 0 : index
    %c0_6 = arith.constant 0 : index
    %5 = vector.load %arg4[%c0_5, %c0_6] : memref<8x4xf32, #tpu.memory_space<vmem>>, vector<8x1xf32>
    %6 = vector.extract_strided_slice %1 {offsets = [0, 0], sizes = [1, 256], strides = [1, 1]} : vector<4x256xf32> to vector<1x256xf32>
    %7 = vector.broadcast %5 : vector<8x1xf32> to vector<8x256xf32>
    %8 = vector.broadcast %6 : vector<1x256xf32> to vector<8x256xf32>
    %9 = arith.mulf %7, %8 : vector<8x256xf32>
    %10 = arith.addf %4, %9 : vector<8x256xf32>
    %c0_7 = arith.constant 0 : index
    %c1 = arith.constant 1 : index
    %11 = vector.load %arg4[%c0_7, %c1] : memref<8x4xf32, #tpu.memory_space<vmem>>, vector<8x1xf32>
    %12 = vector.extract_strided_slice %1 {offsets = [1, 0], sizes = [1, 256], strides = [1, 1]} : vector<4x256xf32> to vector<1x256xf32>
    %13 = vector.broadcast %11 : vector<8x1xf32> to vector<8x256xf32>
    %14 = vector.broadcast %12 : vector<1x256xf32> to vector<8x256xf32>
    %15 = arith.mulf %13, %14 : vector<8x256xf32>
    %16 = arith.addf %10, %15 : vector<8x256xf32>
    %c0_8 = arith.constant 0 : index
    %c2 = arith.constant 2 : index
    %17 = vector.load %arg4[%c0_8, %c2] : memref<8x4xf32, #tpu.memory_space<vmem>>, vector<8x1xf32>
    %18 = vector.extract_strided_slice %1 {offsets = [2, 0], sizes = [1, 256], strides = [1, 1]} : vector<4x256xf32> to vector<1x256xf32>
    %19 = vector.broadcast %17 : vector<8x1xf32> to vector<8x256xf32>
    %20 = vector.broadcast %18 : vector<1x256xf32> to vector<8x256xf32>
    %21 = arith.mulf %19, %20 : vector<8x256xf32>
    %22 = arith.addf %16, %21 : vector<8x256xf32>
    %c0_9 = arith.constant 0 : index
    %c3 = arith.constant 3 : index
    %23 = vector.load %arg4[%c0_9, %c3] : memref<8x4xf32, #tpu.memory_space<vmem>>, vector<8x1xf32>
    %24 = vector.extract_strided_slice %1 {offsets = [3, 0], sizes = [1, 256], strides = [1, 1]} : vector<4x256xf32> to vector<1x256xf32>
    %25 = vector.broadcast %23 : vector<8x1xf32> to vector<8x256xf32>
    %26 = vector.broadcast %24 : vector<1x256xf32> to vector<8x256xf32>
    %27 = arith.mulf %25, %26 : vector<8x256xf32>
    %28 = arith.addf %22, %27 : vector<8x256xf32>
    %c0_10 = arith.constant 0 : index
    %c0_11 = arith.constant 0 : index
    %29 = vector.load %arg5[%c0_10, %c0_11] : memref<8x4xf32, #tpu.memory_space<vmem>>, vector<8x1xf32>
    %30 = vector.extract_strided_slice %3 {offsets = [0, 0], sizes = [1, 256], strides = [1, 1]} : vector<4x256xf32> to vector<1x256xf32>
    %31 = vector.broadcast %29 : vector<8x1xf32> to vector<8x256xf32>
    %32 = vector.broadcast %30 : vector<1x256xf32> to vector<8x256xf32>
    %33 = arith.mulf %31, %32 : vector<8x256xf32>
    %34 = arith.addf %28, %33 : vector<8x256xf32>
    %c0_12 = arith.constant 0 : index
    %c1_13 = arith.constant 1 : index
    %35 = vector.load %arg5[%c0_12, %c1_13] : memref<8x4xf32, #tpu.memory_space<vmem>>, vector<8x1xf32>
    %36 = vector.extract_strided_slice %3 {offsets = [1, 0], sizes = [1, 256], strides = [1, 1]} : vector<4x256xf32> to vector<1x256xf32>
    %37 = vector.broadcast %35 : vector<8x1xf32> to vector<8x256xf32>
    %38 = vector.broadcast %36 : vector<1x256xf32> to vector<8x256xf32>
    %39 = arith.mulf %37, %38 : vector<8x256xf32>
    %40 = arith.addf %34, %39 : vector<8x256xf32>
    %c0_14 = arith.constant 0 : index
    %c2_15 = arith.constant 2 : index
    %41 = vector.load %arg5[%c0_14, %c2_15] : memref<8x4xf32, #tpu.memory_space<vmem>>, vector<8x1xf32>
    %42 = vector.extract_strided_slice %3 {offsets = [2, 0], sizes = [1, 256], strides = [1, 1]} : vector<4x256xf32> to vector<1x256xf32>
    %43 = vector.broadcast %41 : vector<8x1xf32> to vector<8x256xf32>
    %44 = vector.broadcast %42 : vector<1x256xf32> to vector<8x256xf32>
    %45 = arith.mulf %43, %44 : vector<8x256xf32>
    %46 = arith.addf %40, %45 : vector<8x256xf32>
    %c0_16 = arith.constant 0 : index
    %c3_17 = arith.constant 3 : index
    %47 = vector.load %arg5[%c0_16, %c3_17] : memref<8x4xf32, #tpu.memory_space<vmem>>, vector<8x1xf32>
    %48 = vector.extract_strided_slice %3 {offsets = [3, 0], sizes = [1, 256], strides = [1, 1]} : vector<4x256xf32> to vector<1x256xf32>
    %49 = vector.broadcast %47 : vector<8x1xf32> to vector<8x256xf32>
    %50 = vector.broadcast %48 : vector<1x256xf32> to vector<8x256xf32>
    %51 = arith.mulf %49, %50 : vector<8x256xf32>
    %52 = arith.addf %46, %51 : vector<8x256xf32>
    %c0_18 = arith.constant 0 : index
    %c0_19 = arith.constant 0 : index
    %53 = vector.load %arg6[%c0_18, %c0_19] : memref<8x1xf32, #tpu.memory_space<vmem>>, vector<8x1xf32>
    %54 = vector.broadcast %53 : vector<8x1xf32> to vector<8x256xf32>
    %55 = arith.addf %52, %54 : vector<8x256xf32>
    %cst_20 = arith.constant 0.000000e+00 : f32
    %56 = vector.broadcast %cst_20 : f32 to vector<8x256xf32>
    %57 = arith.maximumf %55, %56 : vector<8x256xf32>
    %c0_21 = arith.constant 0 : index
    %c0_22 = arith.constant 0 : index
    %58 = vector.load %arg7[%c0_21, %c0_22] : memref<8x1xf32, #tpu.memory_space<vmem>>, vector<8x1xf32>
    %59 = vector.broadcast %58 : vector<8x1xf32> to vector<8x256xf32>
    %60 = arith.mulf %59, %57 : vector<8x256xf32>
    %cst_23 = arith.constant dense<0.000000e+00> : vector<256xf32>
    %61 = vector.multi_reduction <add>, %60, %cst_23 [0] : vector<8x256xf32> to vector<256xf32>
    %62 = vector.shape_cast %61 : vector<256xf32> to vector<1x256xf32>
    %c0_24 = arith.constant 0 : index
    %63 = memref.load %arg8[%c0_24] : memref<1xf32, #tpu.memory_space<smem>>
    %64 = vector.broadcast %63 : f32 to vector<1x256xf32>
    %65 = arith.addf %62, %64 : vector<1x256xf32>
    %66 = arith.negf %65 : vector<1x256xf32>
    %67 = math.exp %66 : vector<1x256xf32>
    %cst_25 = arith.constant 1.000000e+00 : f32
    %68 = vector.broadcast %cst_25 : f32 to vector<1x256xf32>
    %69 = arith.addf %68, %67 : vector<1x256xf32>
    %70 = arith.divf %68, %69 : vector<1x256xf32>
    %71 = vector.broadcast %70 : vector<1x256xf32> to vector<4x256xf32>
    %72 = arith.mulf %3, %71 : vector<4x256xf32>
    %c0_26 = arith.constant 0 : index
    %c0_27 = arith.constant 0 : index
    %c0_28 = arith.constant 0 : index
    %73 = vector.load %arg9[%c0_26, %c0_27, %c0_28] : memref<1x4x256xf32, #tpu.memory_space<vmem>>, vector<1x4x256xf32>
    %74 = vector.shape_cast %73 : vector<1x4x256xf32> to vector<4x256xf32>
    %75 = vector.shape_cast %72 : vector<4x256xf32> to vector<1x4x256xf32>
    tpu.vector_store %arg9[%c0_26, %c0_27, %c0_28], %75 {strides = array<i32>} : memref<1x4x256xf32, #tpu.memory_space<vmem>>, vector<1x4x256xf32>,
    return
  }
  func.func @transform_0(%arg0: i32, %arg1: i32) -> (i32, i32, i32) {
    %c0_i32 = arith.constant 0 : i32
    %c0_i32_0 = arith.constant 0 : i32
    return %arg0, %c0_i32, %arg1 : i32, i32, i32
  }
  func.func @transform_1(%arg0: i32, %arg1: i32) -> (i32, i32, i32) {
    %c0_i32 = arith.constant 0 : i32
    %c0_i32_0 = arith.constant 0 : i32
    return %arg0, %c0_i32, %arg1 : i32, i32, i32
  }
  func.func @transform_2(%arg0: i32, %arg1: i32) -> (i32, i32) {
    %c0_i32 = arith.constant 0 : i32
    %c0_i32_0 = arith.constant 0 : i32
    %c0_i32_1 = arith.constant 0 : i32
    return %c0_i32, %c0_i32_0 : i32, i32
  }
  func.func @transform_3(%arg0: i32, %arg1: i32) -> (i32, i32) {
    %c0_i32 = arith.constant 0 : i32
    %c0_i32_0 = arith.constant 0 : i32
    %c0_i32_1 = arith.constant 0 : i32
    return %c0_i32, %c0_i32_0 : i32, i32
  }
  func.func @transform_4(%arg0: i32, %arg1: i32) -> (i32, i32) {
    %c0_i32 = arith.constant 0 : i32
    %c0_i32_0 = arith.constant 0 : i32
    %c0_i32_1 = arith.constant 0 : i32
    return %c0_i32, %c0_i32_0 : i32, i32
  }
  func.func @transform_5(%arg0: i32, %arg1: i32) -> (i32, i32) {
    %c0_i32 = arith.constant 0 : i32
    %c0_i32_0 = arith.constant 0 : i32
    %c0_i32_1 = arith.constant 0 : i32
    return %c0_i32, %c0_i32_0 : i32, i32
  }
  func.func @transform_6(%arg0: i32, %arg1: i32) -> i32 {
    %c0_i32 = arith.constant 0 : i32
    %c0_i32_0 = arith.constant 0 : i32
    return %c0_i32 : i32
  }
  func.func @transform_7(%arg0: i32, %arg1: i32) -> (i32, i32, i32) {
    %c0_i32 = arith.constant 0 : i32
    %c0_i32_0 = arith.constant 0 : i32
    return %arg0, %c0_i32, %arg1 : i32, i32, i32
  }
}

</mosaic_0001>

<bundles_post_ra>
// kernel: tpu_custom_call.1
= control target key start
LH: loop header
LB: loop body
LE: loop exit
PB: predicated region body
PF: predicated region fallthrough
CT: control target
= control target key end

     0   :  { %s1110_s0 = inlined_call_operand.vmem [shape: f32[2,4,256], index: 0, kind: input, shape index: {}]   ;;  %s1111_s1 = inlined_call_operand.vmem [shape: f32[2,4,256], index: 1, kind: input, shape index: {}]   ;;  %s1112_s2 = inlined_call_operand.vmem [shape: f32[8,4], index: 2, kind: input, shape index: {}]   ;;  %s1113_s3 = inlined_call_operand.vmem [shape: f32[8,4], index: 3, kind: input, shape index: {}]   ;;  %s1114_s4 = inlined_call_operand.vmem [shape: f32[8,1], index: 4, kind: input, shape index: {}]   ;;  %s1115_s5 = inlined_call_operand.vmem [shape: f32[8,1], index: 5, kind: input, shape index: {}]   ;;  %s1116_s6 = inlined_call_operand.<no memory space> [shape: f32[1], index: 6, kind: input, shape index: {}]   ;;  %s1117_s7 = inlined_call_operand.hbm [shape: f32[2,4,256], index: 7, kind: output, shape index: {}]  }
   0x1   :  { %12 = sst [smem:[#allocation2]] %s1116_s6 }
   0x2   :  { %13 = vsyncpa [#allocation4], 0 }
   0x3   :  { %15 = vsyncpa [#allocation4 + $0x1], 0  ;;  %s948_s26 = smov 0   ;;  %s950_s27 = smov 0  }
   0x4   :  { %s952_s28 = smov 0   ;;  %s954_s29 = smov 0  }
   0x5   :  { %s956_s30 = smov 0   ;;  %s958_s8 = smov 0  }
   0x6 LB: > { %s724_s6 = sadd.s32 4294967295, %s898_s8   ;;  %s725_s9 = sadd.s32 4294967294, %s898_s8   ;;  %s898_s8 = sphi %s958_s8, %s21_s8   ;;  %s894_s30 = sphi %s956_s30, %s1124_s30   ;;  %s890_s29 = sphi %s954_s29, %s1123_s29   ;;  %s886_s28 = sphi %s952_s28, %s1122_s28   ;;  %s882_s27 = sphi %s950_s27, %s1121_s27   ;;  %s878_s26 = sphi %s948_s26, %s1120_s26  }
   0x7   : > { %s33_s10 = sadd.s32 1, %s894_s30  ;;  %s203_s11 = sadd.s32 1, %s886_s28 }
   0x8   : > { %p35_p0 = scmp.ge.s32.totalorder %s33_s10, 2  ;;  %p213_p1 = scmp.ne.s32.totalorder %s886_s28, %s882_s27 }
   0x9   : > { %p214_p2 = scmp.eq.s32.totalorder %s724_s6, 1  ;;  %p219_p3 = scmp.ne.s32.totalorder %s882_s27, %s878_s26 }
   0xa   : > { %s1126_s10 = smov (%p35_p0, %s33_s10), 0  ;;  %p220_p5 = scmp.eq.s32.totalorder %s725_s9, 1 }
   0xb   : > { %p988_p4 = por %p214_p2, %p213_p1  ;;  %s198_s13 = ssub.s32 %s894_s30, %s1126_s10 }
   0xc   : > { %p728_p6 = scmp.ge.s32.totalorder %s898_s8, 1  ;;  %p201_p7 = scmp.eq.s32.totalorder %s198_s13, 0 }
   0xd   : > { %p995_p8 = por %p220_p5, %p219_p3  ;;  %p279_p9 = scmp.lt.s32.totalorder %s898_s8, 3 }
   0xe   : > { %s1001_s15 = scalar_select %p201_p7, %s886_s28, %s203_s11  }
   0xf   : > { %p280_p10 = pnand %p728_p6, %p279_p9 }
  0x10   : > { %v347_v0 = vld [vmem:[%s1112_s2] sm:$0xff] (!%p280_p10)  ;;  %v900_v1 = vmov (!%p280_p10), 2   ;;  %v901_v2 = vmov (!%p280_p10), 0   ;;  %v902_v3 = vmov (!%p280_p10), 3   ;;  %v903_v4 = vmov (!%p280_p10), 1   ;;  %p325_p11 = scmp.lt.s32.totalorder (!%p280_p10), %s890_s29, 1 }
  0x11   : > { %283 = sbr.rel (%p280_p10) target bundleno = 232 (0xe8), region = 48  ;;  %805 = vset.pattern.permute.xlu1 (!%p280_p10), %v900_v1  ;;  %803 = vset.pattern.permute.xlu0 (!%p280_p10), %v901_v2  ;;  %v454_v5 = vld [vmem:[%s1113_s3] sm:$0xff] (!%p280_p10)  ;;  %v354_v8 = vlaneseq (!%p280_p10)  ;;  %s591_s18 = sld [smem:[#allocation2]] (!%p280_p10) }
  0x12   : > { %403 = vperm.xlu1 (!%p280_p10), %805, %v347_v0   ;;  %350 = vperm.xlu0 (!%p280_p10), %803, %v347_v0   ;;  %v561_v6 = vld [vmem:[%s1114_s4] sm:$0xff] (!%p280_p10)  ;;  %s321_s19 = sand.u32 (!%p280_p10), 1, %s882_s27   ;;  %s743_s21 = sshll.u32 (!%p280_p10), %s890_s29, 7 }
  0x13   : > { %v571_v7 = vld [vmem:[%s1115_s5] sm:$0xff] (!%p280_p10)  ;;  %v355_v9 = vshrl.u32 (!%p280_p10), %v354_v8, 7  ;;  %s729_s20 = sshll.u32 (!%p280_p10), %s321_s19, 3  ;;  %s1063_s6 = scalar_lea.hbm (!%p280_p10), %s1117_s7, %s743_s21 }
  0x14   : > { %s323_s22 = scalar_lea.vmem (!%p280_p10), [#allocation3], %s729_s20  ;;  %s614_s9 = scalar_lea.sflag (!%p280_p10), [#allocation4], %s321_s19 }
  0x15   : > { %v356_v10 = vsub.s32 (!%p280_p10), 0, %v355_v9  ;;  %v360_v11 = vsub.s32 (!%p280_p10), 4, %v355_v9  ;;  %v1020_v12 = vsub.s32 (!%p280_p10), 1, %v355_v9  ;;  %v386_v13 = vsub.s32 (!%p280_p10), 5, %v355_v9  ;;  %s630_s23 = sshll.u32 (!%p280_p10), %s323_s22, 4  ;;  %s1065_s23 = int_to_ptr.vmem [resolvable:$true] %s630_s23 }
  0x16   : > { %806 = vset.pattern.permute.xlu1 (!%p280_p10), %v902_v3  ;;  %804 = vset.pattern.permute.xlu0 (!%p280_p10), %v903_v4  ;;  %v1022_v15 = vsub.s32 (!%p280_p10), 2, %v355_v9  ;;  %v412_v16 = vsub.s32 (!%p280_p10), 6, %v355_v9  ;;  %v1024_v17 = vsub.s32 (!%p280_p10), 3, %v355_v9  ;;  %v438_v18 = vsub.s32 (!%p280_p10), 7, %v355_v9 }
  0x17   : > { %429 = vperm.xlu1 (!%p280_p10), %806, %v347_v0   ;;  %377 = vperm.xlu0 (!%p280_p10), %804, %v347_v0  }
  0x18   : > { %s326_s24 = scalar_select %p325_p11, %s890_s29, 1 }
  0x19   : > { %s904_s29 = smov [#allocation3]  }
  0x1a   : > { %s741_s25 = sshll.u32 %s326_s24, 3  ;;  %s824_s13 = sshll.u32 %s904_s29, 4  ;;  %s825_s13 = int_to_ptr.vmem [resolvable:$false] %s824_s13 }
  0x1b   : > { %807 = vset.pattern.permute.xlu1 %v901_v2  ;;  %484 = vperm.xlu0 %804, %v454_v5   ;;  %s332_s11 = scalar_lea.vmem %s1110_s0, %s741_s25  ;;  %s342_s17 = scalar_lea.vmem %s1111_s1, %s741_s25 }
  0x1c   : > { %457 = vperm.xlu1 %807, %v454_v5   ;;  %v345_v14 = vld [vmem:[%s332_s11] sm:$0xff]  ;;  %s820_s11 = scalar_lea.vmem %s1065_s23, 128  ;;  %s826_s16 = scalar_lea.vmem %s825_s13, 256 }
  0x1d   : > { %v357_v19 = vrot.slane %v345_v14, %v356_v10  ;;  %v361_v20 = vrot.slane %v345_v14, %v360_v11  ;;  %v383_v21 = vrot.slane %v345_v14, %v1020_v12  ;;  %v387_v22 = vrot.slane %v345_v14, %v386_v13  ;;  %v1030_v24 = vld [vmem:[%s342_s17] sm:$0xff]  ;;  %p821_p12 = scmp.ne.s32.totalorder %s1065_s23, %s820_s11  ;;  %p827_p1 = scmp.lt.s32.totalorder %s1065_s23, %s825_s13 }
  0x1e   : > { %v409_v25 = vrot.slane %v345_v14, %v1022_v15  ;;  %v413_v26 = vrot.slane %v345_v14, %v412_v16  ;;  %v435_v28 = vrot.slane %v345_v14, %v1024_v17  ;;  %v439_v29 = vrot.slane %v345_v14, %v438_v18  ;;  %p828_p2 = scmp.lt.s32.totalorder %s826_s16, %s820_s11 }
  0x1f   : > { %809 = vset.pattern.permute.xlu0 %v902_v3  ;;  %v367_v30 = vrot.slane %v357_v19, %v356_v10  ;;  %v371_v31 = vrot.slane %v361_v20, %v356_v10  ;;  %v393_v32 = vrot.slane %v383_v21, %v1020_v12  ;;  %v397_v33 = vrot.slane %v387_v22, %v1020_v12  ;;  %p822_p13 = pnand %p821_p12, %p988_p4 }
  0x20   : > { %808 = vset.pattern.permute.xlu1 %v900_v1  ;;  %536 = vperm.xlu0 %809, %v454_v5   ;;  %v464_v34 = vrot.slane %v1030_v24, %v356_v10  ;;  %v468_v35 = vrot.slane %v1030_v24, %v360_v11  ;;  %v419_v36 = vrot.slane %v409_v25, %v1022_v15  ;;  %p829_p3 = por %p828_p2, %p827_p1 }
  0x21   : > { %510 = vperm.xlu1 %808, %v454_v5   ;;  %v423_v37 = vrot.slane %v413_v26, %v1022_v15  ;;  %v445_v38 = vrot.slane %v435_v28, %v1024_v17  ;;  %v449_v39 = vrot.slane %v439_v29, %v1024_v17  ;;  %v490_v42 = vrot.slane %v1030_v24, %v1020_v12  ;;  %p823_p0 = pneg %p822_p13 }
  0x22   : > { %v494_v43 = vrot.slane %v1030_v24, %v386_v13  ;;  %v516_v44 = vrot.slane %v1030_v24, %v1022_v15  ;;  %v520_v45 = vrot.slane %v1030_v24, %v412_v16  ;;  %v474_v50 = vrot.slane %v464_v34, %v356_v10 }
  0x23   : > { %v478_v51 = vrot.slane %v468_v35, %v356_v10  ;;  %v542_v52 = vrot.slane %v1030_v24, %v1024_v17  ;;  %v546_v53 = vrot.slane %v1030_v24, %v438_v18  ;;  %v500_v58 = vrot.slane %v490_v42, %v1020_v12  ;;  %p830_p5 = pnand %p829_p3, %p823_p0 }
  0x24   : > { %811 = vset.pattern.permute.xlu0 %v901_v2  ;;  %v504_v59 = vrot.slane %v494_v43, %v1020_v12  ;;  %v526_v8 = vrot.slane %v516_v44, %v1022_v15  ;;  %v530_v9 = vrot.slane %v520_v45, %v1022_v15  ;;  %v592_v45 = vstv %s591_s18 }
  0x25   : > { %810 = vset.pattern.permute.xlu1 %v901_v2  ;;  %v552_v4 = vrot.slane %v542_v52, %v1024_v17  ;;  %v556_v5 = vrot.slane %v546_v53, %v1024_v17 }
  0x26   : > { %564 = vperm.xlu1 %810, %v561_v6  }
  0x2a   : > { %574 = vperm.xlu1 %810, %v571_v7  }
  0x91   : > { %v404_v23 = vpop.permute.xlu1 %403  ;;  %v351_v27 = vpop.permute.xlu0 %350 }
  0x92   : > { %v372_v46 = vmul.f32 %v367_v30, %v351_v27  ;;  %v373_v47 = vmul.f32 %v371_v31, %v351_v27  ;;  %v424_v54 = vmul.f32 %v419_v36, %v404_v23  ;;  %v425_v55 = vmul.f32 %v423_v37, %v404_v23 }
  0x96   : > { %v430_v40 = vpop.permute.xlu1 %429  ;;  %v378_v41 = vpop.permute.xlu0 %377 }
  0x97   : > { %v398_v48 = vmul.f32 %v393_v32, %v378_v41  ;;  %v399_v49 = vmul.f32 %v397_v33, %v378_v41  ;;  %v450_v60 = vmul.f32 %v445_v38, %v430_v40  ;;  %v451_v61 = vmul.f32 %v449_v39, %v430_v40 }
  0x99   : > { %v400_v56 = vadd.f32 %v398_v48, %v372_v46  ;;  %v401_v57 = vadd.f32 %v399_v49, %v373_v47 }
  0x9a   : > { %v485_v0 = vpop.permute.xlu0 %484 }
  0x9b   : > { %v426_v62 = vadd.f32 %v424_v54, %v400_v56  ;;  %v427_v63 = vadd.f32 %v425_v55, %v401_v57  ;;  %v458_v1 = vpop.permute.xlu1 %457  ;;  %v505_v10 = vmul.f32 %v500_v58, %v485_v0  ;;  %v506_v11 = vmul.f32 %v504_v59, %v485_v0 }
  0x9c   : > { %v479_v2 = vmul.f32 %v474_v50, %v458_v1  ;;  %v480_v3 = vmul.f32 %v478_v51, %v458_v1 }
  0x9d   : > { %v452_v6 = vadd.f32 %v450_v60, %v426_v62  ;;  %v453_v7 = vadd.f32 %v451_v61, %v427_v63 }
  0x9f   : > { %v481_v12 = vadd.f32 %v479_v2, %v452_v6  ;;  %v482_v13 = vadd.f32 %v480_v3, %v453_v7  ;;  %v537_v14 = vpop.permute.xlu0 %536 }
  0xa0   : > { %v511_v16 = vpop.permute.xlu1 %510  ;;  %v557_v18 = vmul.f32 %v552_v4, %v537_v14  ;;  %v558_v19 = vmul.f32 %v556_v5, %v537_v14 }
  0xa1   : > { %v507_v20 = vadd.f32 %v505_v10, %v481_v12  ;;  %v508_v21 = vadd.f32 %v506_v11, %v482_v13  ;;  %v531_v22 = vmul.f32 %v526_v8, %v511_v16  ;;  %v532_v23 = vmul.f32 %v530_v9, %v511_v16 }
  0xa3   : > { %v533_v25 = vadd.f32 %v531_v22, %v507_v20  ;;  %v534_v17 = vadd.f32 %v532_v23, %v508_v21 }
  0xa5   : > { %v559_v26 = vadd.f32 %v557_v18, %v533_v25  ;;  %v560_v27 = vadd.f32 %v558_v19, %v534_v17  ;;  %v565_v28 = vpop.permute.xlu1 %564 }
  0xa7   : > { %v567_v29 = vadd.f32 %v565_v28, %v559_v26  ;;  %v568_v30 = vadd.f32 %v565_v28, %v560_v27 }
  0xa9   : > { %v569_v15 = vmax.f32 %v567_v29, 0.0  ;;  %v570_v31 = vmax.f32 %v568_v30, 0.0  ;;  %v575_v32 = vpop.permute.xlu1 %574 }
  0xab   : > { %v577_v33 = vmul.f32 %v575_v32, %v569_v15  ;;  %v578_v34 = vmul.f32 %v575_v32, %v570_v31 }
  0xad   : > { %v579_v35 = vrot.slane %v577_v33, 4  ;;  %v585_v36 = vrot.slane %v578_v34, 4 }
  0xaf   : > { %v580_v37 = vadd.f32 %v579_v35, %v577_v33  ;;  %v586_v38 = vadd.f32 %v585_v36, %v578_v34 }
  0xb1   : > { %v581_v39 = vrot.slane %v580_v37, 2  ;;  %v587_v40 = vrot.slane %v586_v38, 2 }
  0xb3   : > { %v582_v41 = vadd.f32 %v581_v39, %v580_v37  ;;  %v588_v42 = vadd.f32 %v587_v40, %v586_v38 }
  0xb5   : > { %v583_v43 = vrot.slane %v582_v41, 1  ;;  %v589_v44 = vrot.slane %v588_v42, 1 }
  0xb7   : > { %v584_v46 = vadd.f32 %v583_v43, %v582_v41  ;;  %v590_v47 = vadd.f32 %v589_v44, %v588_v42 }
  0xb9   : > { %v593_v48 = vadd.f32 %v592_v45, %v584_v46  ;;  %v594_v49 = vadd.f32 %v592_v45, %v590_v47 }
  0xbb   : > { %v734_v50 = vmul.f32 -1.442695, %v593_v48  ;;  %v735_v51 = vmul.f32 -1.442695, %v594_v49 }
  0xbd   : > { %812 = vpow2.f32 %v734_v50 }
  0xbe   : > { %814 = vpow2.f32 %v735_v51 }
  0xc7   : > { %v813_v52 = vpop.eup %812 }
  0xc8   : > { %v815_v53 = vpop.eup %814  ;;  %v601_v54 = vadd.f32 1.0, %v813_v52 }
  0xc9   : > { %v602_v55 = vadd.f32 1.0, %v815_v53 }
  0xca   : > { %816 = vrcp.f32 %v601_v54 }
  0xcb   : > { %818 = vrcp.f32 %v602_v55 }
  0xd4   : > { %v817_v56 = vpop.eup %816 }
  0xd5   : > { %v819_v57 = vpop.eup %818 }
  0xd6   : > { %v609_v58 = vcombine.low %v817_v56, %v819_v57 }
  0xd8   : > { %v611_v59 = vmul.f32 %v609_v58, %v1030_v24 }
  0xda   : > { %612 = vst [vmem:[%s323_s22] sm:$0xff] %v611_v59 }
  0xdb   : > { %833 = shalt.err (!%p830_p5)
}
  0xdc   : > { %s834_s17 = scalar_lea.hbm %s1063_s6, 128  ;;  %s838_s20 = scalar_lea.hbm %s1117_s7, 256 }
  0xdd   : > { %p835_p6 = scmp.ne.s32.totalorder %s1063_s6, %s834_s17  ;;  %p839_p10 = scmp.lt.u32.totalorder %s1063_s6, %s1117_s7 }
  0xde   : > { %p840_p11 = scmp.lt.u32.totalorder %s838_s20, %s834_s17  ;;  %p842_p13 = scmp.lt.u32.totalorder %s834_s17, %s1063_s6 }
  0xdf   : > { %p836_p7 = pnand %p835_p6, %p988_p4 }
  0xe0   : > { %p841_p12 = por %p840_p11, %p839_p10 }
  0xe1   : > { %p837_p9 = pneg %p836_p7 }
  0xe2   : > { %p843_p0 = por %p842_p13, %p841_p12 }
  0xe4   : > { %p844_p1 = pnand %p843_p0, %p837_p9 }
  0xe6   : > { %847 = shalt.err (!%p844_p1)
}
  0xe7   : > { %744 = dma.vmem_to_hbm [thread:$0]  (%p988_p4), %s1065_s23, 128, %s1063_s6, %s614_s9  }
  0xe8 PF: > { %p750_p2 = scmp.ge.s32.totalorder %s898_s8, 2  ;;  %s642_s24 = sand.u32 1, %s878_s26  }
  0xe9   : > { %s643_s25 = scalar_lea.sflag [#allocation4], %s642_s24 }
  0xea   : > { %p747_p3 = pnand %p750_p2, %p995_p8 }
  0xec   : > { %873 = dma.done.wait (!%p747_p3), %s643_s25, 128  }
  0xed   : > { %875 = vsyncadd (!%p747_p3), %s643_s25, 4294967168  ;;  %s21_s8 = sadd.s32 1, %s898_s8   ;;  %s1120_s26 = smov %s882_s27 }
  0xee   : > { %p18_p5 = scmp.ge.s32.totalorder %s21_s8, 4   ;;  %s1121_s27 = smov %s886_s28 }
  0xef   : > { %s1122_s28 = smov %s1001_s15  ;;  %s1123_s29 = smov %s894_s30 }
  0xf0   : > { %s1124_s30 = smov %s1126_s10  ;;  %20 = sbr.rel (!%p18_p5) target bundleno = 6 (0x6), region = 86 }
  0xf7   :  { %648 = vsyncpa [#allocation4], 1 }
  0xf8   :  { %650 = vsyncpa [#allocation4 + $0x1], 1 }

</bundles_post_ra>
